<compile_context>
chip_gen: v7x
topology: tpu7x:2x2x1
jax: 0.10.0
libtpu: 0.0.40
codegen_flags: <defaults>
</compile_context>

<pallas_src>
import jax
import jax.numpy as jnp
import numpy as np
from jax.experimental import pallas as pl
from jax.experimental.pallas import tpu as pltpu


_CLAMP_MIN = 1e-5


def _cdiv(a, b):
    return -(-a // b)


def _round_up(x, m):
    return ((x + m - 1) // m) * m


def _vmem_capacity():
    try:
        cap = getattr(pltpu.get_tpu_info(), "vmem_capacity_bytes", None)
        if cap:
            return int(cap)
    except Exception:
        pass
    return 64 * 1024 * 1024          # conservative (v7x per-core) fallback


# ---------------------------------------------------------------------------
# kernels
# ---------------------------------------------------------------------------

def _make_probs_kernel(n_units, u_pad):
    """Emit log(clamp(meas)) logits; padded unit columns masked to -1e30."""
    mask_pad = n_units < u_pad

    def kernel(rho_r_ref, rho_i_ref, prw_ref, npiw_ref, out_ref):
        kk = pl.program_id(1)

        @pl.when(kk == 0)
        def _():
            out_ref[...] = jnp.zeros_like(out_ref)

        cdt = prw_ref.dtype
        out_ref[...] += (
            jnp.dot(rho_r_ref[...].astype(cdt), prw_ref[...],
                    preferred_element_type=jnp.float32)
            + jnp.dot(rho_i_ref[...].astype(cdt), npiw_ref[...],
                      preferred_element_type=jnp.float32))

        @pl.when(kk == pl.num_programs(1) - 1)
        def _():
            logits = jnp.log(jnp.maximum(out_ref[...], _CLAMP_MIN))
            if mask_pad:
                col = jax.lax.broadcasted_iota(jnp.int32,
                                               (out_ref.shape[0], u_pad), 1)
                logits = jnp.where(col < n_units, logits, jnp.float32(-1e30))
            out_ref[...] = logits

    return kernel


def _ensemble_kernel(rho_r_ref, rho_i_ref, prw_ref, npiw_ref, ens_w_ref,
                     out_ref, acc_ref):
    kk = pl.program_id(1)

    @pl.when(kk == 0)
    def _():
        acc_ref[...] = jnp.zeros_like(acc_ref)

    cdt = prw_ref.dtype
    acc_ref[...] += (
        jnp.dot(rho_r_ref[...].astype(cdt), prw_ref[...],
                preferred_element_type=jnp.float32)
        + jnp.dot(rho_i_ref[...].astype(cdt), npiw_ref[...],
                  preferred_element_type=jnp.float32))

    @pl.when(kk == pl.num_programs(1) - 1)
    def _():
        # clamp only on the fully-accumulated measurement (finalize branch)
        meas = jnp.maximum(acc_ref[...], _CLAMP_MIN)
        out_ref[...] = jnp.dot(meas, ens_w_ref[...],
                               preferred_element_type=jnp.float32)


# ---------------------------------------------------------------------------
# tiling / VMEM planning
# ---------------------------------------------------------------------------

def _pick_tile_k(dd, u_pad, w_itemsize, chunk_budget):
    """Largest multiple-of-128 divisor of dd whose streamed weight chunk fits."""
    full_bytes = 2 * dd * u_pad * w_itemsize        # both slabs, single-buffered
    if dd % 128 != 0 or full_bytes <= chunk_budget:
        return dd                                    # single K step (weights resident)
    per128 = 2 * 2 * 128 * u_pad * w_itemsize        # both slabs, double-buffered
    max_mult = min(dd // 128, max(1, chunk_budget // per128))
    best = 128
    m = 2
    while m <= max_mult:
        if dd % (m * 128) == 0:
            best = m * 128
        m += 1
    return best


def _plan(bt, dd, u_pad, out_cols, rho_itemsize, w_itemsize, has_ens,
          max_weight_chunk_bytes=None):
    vmem_cap = _vmem_capacity()
    budget = max(24 << 20, int(vmem_cap * 0.72))     # ~46 MiB v7x, ~92 MiB v5e/v6e
    chunk_budget = (max_weight_chunk_bytes if max_weight_chunk_bytes is not None
                    else budget // 3)
    tile_k = _pick_tile_k(dd, u_pad, w_itemsize, chunk_budget)
    n_k = dd // tile_k
    w_bufs = 1 if n_k == 1 else 2                    # Buffered(1) when slab is constant

    weight_fixed = w_bufs * 2 * tile_k * u_pad * w_itemsize
    if has_ens:
        weight_fixed += u_pad * out_cols * 4         # ens_w, single-buffered
    per_row = (2 * 2 * tile_k * rho_itemsize         # rho_r + rho_i, double-buffered
               + 2 * out_cols * 4)                   # output, double-buffered
    if has_ens:
        per_row += u_pad * 4                         # f32 accumulator scratch

    avail = max(budget - weight_fixed, 8 * per_row)
    tile_rows = min(512, avail // per_row)
    # target >= 4 row steps (even pipeline fill/drain; keeps both v7x TCs busy)
    tile_rows = min(tile_rows, max(8, _round_up(_cdiv(bt, 4), 8)))
    tile_rows = max(8, (int(tile_rows) // 8) * 8)

    need = weight_fixed + tile_rows * per_row
    vmem_limit = need + (8 << 20)                    # need-based + headroom
    vmem_limit = max(vmem_limit, 32 << 20)
    vmem_limit = int(min(vmem_limit, vmem_cap - (2 << 20)))
    return tile_rows, tile_k, n_k, vmem_limit


# ---------------------------------------------------------------------------
# pallas_call wrappers
# ---------------------------------------------------------------------------

def _run_probs(rho_r, rho_i, prw, npiw, n_units, tile_rows, tile_k, vmem_limit):
    bt, dd = rho_r.shape
    u_pad = prw.shape[1]
    n_k = dd // tile_k
    grid = (_cdiv(bt, tile_rows), n_k)
    w_pm = pl.Buffered(1) if n_k == 1 else None
    cost = pl.CostEstimate(
        flops=int(4 * bt * dd * u_pad),
        transcendentals=int(bt * u_pad),
        bytes_accessed=int(2 * bt * dd * rho_r.dtype.itemsize
                           + 2 * dd * u_pad * prw.dtype.itemsize
                           + bt * u_pad * 4))
    return pl.pallas_call(
        _make_probs_kernel(n_units, u_pad),
        out_shape=jax.ShapeDtypeStruct((bt, u_pad), jnp.float32),
        grid_spec=pltpu.PrefetchScalarGridSpec(
            num_scalar_prefetch=0,
            grid=grid,
            in_specs=[
                pl.BlockSpec((tile_rows, tile_k), lambda i, k: (i, k)),
                pl.BlockSpec((tile_rows, tile_k), lambda i, k: (i, k)),
                pl.BlockSpec((tile_k, u_pad), lambda i, k: (k, 0), pipeline_mode=w_pm),
                pl.BlockSpec((tile_k, u_pad), lambda i, k: (k, 0), pipeline_mode=w_pm),
            ],
            out_specs=pl.BlockSpec((tile_rows, u_pad), lambda i, k: (i, 0))),
        compiler_params=pltpu.CompilerParams(
            dimension_semantics=("parallel", "arbitrary"),
            vmem_limit_bytes=vmem_limit),
        cost_estimate=cost,
    )(rho_r, rho_i, prw, npiw)


def _run_ensemble(rho_r, rho_i, prw, npiw, ens_w, tile_rows, tile_k, vmem_limit):
    bt, dd = rho_r.shape
    u_pad = prw.shape[1]
    out_cols = ens_w.shape[1]
    n_k = dd // tile_k
    grid = (_cdiv(bt, tile_rows), n_k)
    w_pm = pl.Buffered(1) if n_k == 1 else None
    cost = pl.CostEstimate(
        flops=int(4 * bt * dd * u_pad + 2 * bt * u_pad * out_cols),
        transcendentals=0,
        bytes_accessed=int(2 * bt * dd * rho_r.dtype.itemsize
                           + 2 * dd * u_pad * prw.dtype.itemsize
                           + u_pad * out_cols * 4
                           + bt * out_cols * 4))
    return pl.pallas_call(
        _ensemble_kernel,
        out_shape=jax.ShapeDtypeStruct((bt, out_cols), jnp.float32),
        grid_spec=pltpu.PrefetchScalarGridSpec(
            num_scalar_prefetch=0,
            grid=grid,
            in_specs=[
                pl.BlockSpec((tile_rows, tile_k), lambda i, k: (i, k)),
                pl.BlockSpec((tile_rows, tile_k), lambda i, k: (i, k)),
                pl.BlockSpec((tile_k, u_pad), lambda i, k: (k, 0), pipeline_mode=w_pm),
                pl.BlockSpec((tile_k, u_pad), lambda i, k: (k, 0), pipeline_mode=w_pm),
                pl.BlockSpec((u_pad, out_cols), lambda i, k: (0, 0),
                             pipeline_mode=pl.Buffered(1)),
            ],
            out_specs=pl.BlockSpec((tile_rows, out_cols), lambda i, k: (i, 0)),
            scratch_shapes=[pltpu.VMEM((tile_rows, u_pad), jnp.float32)]),
        compiler_params=pltpu.CompilerParams(
            dimension_semantics=("parallel", "arbitrary"),
            vmem_limit_bytes=vmem_limit),
        cost_estimate=cost,
    )(rho_r, rho_i, prw, npiw, ens_w)


# ---------------------------------------------------------------------------
# module-level API
# ---------------------------------------------------------------------------

def init_complex_proj_measurement_params(embed_dim):
    # ComplexMeasurement(embed_dim, units=embed_dim, ortho_init=True):
    #   kernel = stack([eye(embed_dim), zeros(embed_dim, embed_dim)], dim=-1)
    real = jnp.eye(embed_dim, dtype=jnp.float32)
    imag = jnp.zeros((embed_dim, embed_dim), dtype=jnp.float32)
    return jnp.stack([real, imag], axis=-1)          # (units, embed_dim, 2)


def _prepare_weights(kernel_param, compute_dtype):
    kr = kernel_param[:, :, 0].astype(jnp.float32)   # (units, embed_dim)
    ki = kernel_param[:, :, 1].astype(jnp.float32)
    units, ed = kr.shape
    dd = ed * ed
    u_pad = _round_up(units, 128)
    # rank-1 projectors P_k = |k><k| (parameter-side setup, plain-JAX glue)
    pr = jnp.einsum('ui,uj->uij', kr, kr) + jnp.einsum('ui,uj->uij', ki, ki)
    pi = jnp.einsum('ui,uj->uij', ki, kr) - jnp.einsum('ui,uj->uij', kr, ki)
    prw = pr.reshape(units, dd).T                    # (dd, units)
    npiw = (-pi.reshape(units, dd)).T                # "- rho_i @ Pi" folded in
    if u_pad != units:
        pad = ((0, 0), (0, u_pad - units))
        prw = jnp.pad(prw, pad)
        npiw = jnp.pad(npiw, pad)
    return kr, ki, prw.astype(compute_dtype), npiw.astype(compute_dtype), units, u_pad


def measurement_logits(inputs, kernel_param, compute_dtype=jnp.float32,
                       max_weight_chunk_bytes=None):
    """log(clamped measurement) per token, (b*t, u_pad); padded cols masked to -1e30."""
    input_real, input_imag = inputs
    b, t, d, _ = input_real.shape
    bt, dd = b * t, d * d
    _, _, prw, npiw, units, u_pad = _prepare_weights(kernel_param, compute_dtype)
    rho_r = input_real.reshape(bt, dd)               # metadata-only reshapes
    rho_i = input_imag.reshape(bt, dd)
    tile_rows, tile_k, _, vlim = _plan(
        bt, dd, u_pad, u_pad, rho_r.dtype.itemsize,
        jnp.dtype(compute_dtype).itemsize, False, max_weight_chunk_bytes)
    return _run_probs(rho_r, rho_i, prw, npiw, units, tile_rows, tile_k, vlim)


def complex_proj_measurement(inputs, kernel_param, method='sample', rng_key=None,
                             compute_dtype=jnp.float32, max_weight_chunk_bytes=None):
    """Forward pass of ComplexProjMeasurement.

    compute_dtype=jnp.bfloat16 keeps the projector slabs in bf16 (half the
    resident weight VMEM, native bf16 MXU) and casts the rho tiles in-kernel;
    accumulation stays f32.  Default f32 keeps full accuracy.
    """
    if not isinstance(inputs, (list, tuple)):
        raise ValueError('This layer should be called on a list of 2 inputs.')
    if len(inputs) != 2:
        raise ValueError('This layer should be called on a list of 2 inputs.'
                         'Got ' + str(len(inputs)) + ' inputs.')
    input_real, input_imag = inputs
    b, t, d, _ = input_real.shape
    bt, dd = b * t, d * d

    kr, ki, prw, npiw, units, u_pad = _prepare_weights(kernel_param, compute_dtype)
    rho_r = input_real.reshape(bt, dd)               # no concat/cast/pad of rho
    rho_i = input_imag.reshape(bt, dd)
    rho_isz = rho_r.dtype.itemsize
    w_isz = jnp.dtype(compute_dtype).itemsize

    if method == 'ensemble':
        out_cols = _round_up(2 * d, 128)
        # fused [kernel_real | kernel_imag] rhs; zero rows for padded units so the
        # clamped (1e-5) padded measurement columns contribute nothing.
        ens_w = jnp.concatenate([kr, ki], axis=1)                        # (units, 2*d)
        ens_w = jnp.pad(ens_w, ((0, u_pad - units),
                                (0, out_cols - 2 * d))).astype(jnp.float32)
        tile_rows, tile_k, _, vlim = _plan(bt, dd, u_pad, out_cols, rho_isz, w_isz,
                                           True, max_weight_chunk_bytes)
        out = _run_ensemble(rho_r, rho_i, prw, npiw, ens_w, tile_rows, tile_k, vlim)
        real_e = out[:, :d].reshape(b, t, d)
        imag_e = out[:, d:2 * d].reshape(b, t, d)
        return [real_e, imag_e]
    elif method == 'sample':
        if rng_key is None:
            raise ValueError("method='sample' requires rng_key")
        tile_rows, tile_k, _, vlim = _plan(bt, dd, u_pad, u_pad, rho_isz, w_isz,
                                           False, max_weight_chunk_bytes)
        logits = _run_probs(rho_r, rho_i, prw, npiw, units, tile_rows, tile_k, vlim)
        # torch.multinomial(1) on the unnormalized clamped weights == categorical on
        # their logs.  Padded unit columns are masked to -1e30 in-kernel.
        # TODO(synk): the Gumbel/multinomial RNG draw + row gather stay in plain JAX;
        # only measurement + clamp + log (+ pad masking) run in the Pallas kernel.
        idx = jax.random.categorical(rng_key, logits, axis=-1)           # (bt,)
        real_s = jnp.take(kr, idx, axis=0).reshape(b, t, d)
        imag_s = jnp.take(ki, idx, axis=0).reshape(b, t, d)
        return [real_s, imag_s]
    else:
        raise ValueError('unknown method: ' + str(method))


if __name__ == "__main__":
    B, T, D = 2, 8, 16
    key = jax.random.PRNGKey(0)
    k1, k2, k3, k4 = jax.random.split(key, 4)

    # pure-state density matrices rho = |v><v| per (batch, seq) position
    vr = jax.random.normal(k1, (B, T, D), dtype=jnp.float32)
    vi = jax.random.normal(k2, (B, T, D), dtype=jnp.float32)
    norm = jnp.sqrt(jnp.sum(vr * vr + vi * vi, axis=-1, keepdims=True))
    vr, vi = vr / norm, vi / norm
    rho_r = jnp.einsum('bti,btj->btij', vr, vr) + jnp.einsum('bti,btj->btij', vi, vi)
    rho_i = jnp.einsum('bti,btj->btij', vi, vr) - jnp.einsum('bti,btj->btij', vr, vi)

    # plain-JAX reference for a random (non-orthogonal) measurement kernel
    kernel_rand = jax.random.normal(k4, (D, D, 2), dtype=jnp.float32) * 0.5
    kr_r, ki_r = kernel_rand[:, :, 0], kernel_rand[:, :, 1]
    pr_ref = jnp.einsum('ui,uj->uij', kr_r, kr_r) + jnp.einsum('ui,uj->uij', ki_r, ki_r)
    pi_ref = jnp.einsum('ui,uj->uij', ki_r, kr_r) - jnp.einsum('ui,uj->uij', kr_r, ki_r)
    meas_ref = jnp.maximum(jnp.einsum('btij,uij->btu', rho_r, pr_ref)
                           - jnp.einsum('btij,uij->btu', rho_i, pi_ref), 1e-5)
    ref_r = jnp.einsum('btu,ud->btd', meas_ref, kr_r)
    ref_i = jnp.einsum('btu,ud->btd', meas_ref, ki_r)

    # (a) ensemble, single-K path (weights VMEM-resident, Buffered(1))
    out_r, out_i = complex_proj_measurement([rho_r, rho_i], kernel_rand, method='ensemble')
    out_r = jax.block_until_ready(out_r)
    out_i = jax.block_until_ready(out_i)
    np.testing.assert_allclose(np.asarray(out_r), np.asarray(ref_r), rtol=1e-4, atol=1e-4)
    np.testing.assert_allclose(np.asarray(out_i), np.asarray(ref_i), rtol=1e-4, atol=1e-4)

    # (b) ensemble, forced K-tiling (streamed weights + accumulator finalize path)
    out_r2, out_i2 = complex_proj_measurement([rho_r, rho_i], kernel_rand,
                                              method='ensemble',
                                              max_weight_chunk_bytes=64 * 1024)
    out_r2 = jax.block_until_ready(out_r2)
    np.testing.assert_allclose(np.asarray(out_r2), np.asarray(ref_r), rtol=1e-4, atol=1e-4)
    np.testing.assert_allclose(np.asarray(out_i2), np.asarray(ref_i), rtol=1e-4, atol=1e-4)

    # (c) sample-path measurement logits: valid columns == log(clamped meas),
    #     padded columns masked off; K-tiled variant matches.
    logits = jax.block_until_ready(measurement_logits([rho_r, rho_i], kernel_rand))
    np.testing.assert_allclose(np.asarray(logits[:, :D]),
                               np.asarray(jnp.log(meas_ref).reshape(B * T, D)),
                               rtol=1e-4, atol=1e-4)
    assert np.all(np.asarray(logits[:, D:]) <= -1e29)
    logits_kt = jax.block_until_ready(
        measurement_logits([rho_r, rho_i], kernel_rand, max_weight_chunk_bytes=64 * 1024))
    np.testing.assert_allclose(np.asarray(logits_kt), np.asarray(logits),
                               rtol=1e-5, atol=1e-5)

    # (d) default ortho-init kernel: ensemble real output == clamped diag(rho_r), imag == 0
    kernel_param = init_complex_proj_measurement_params(D)
    ens_r, ens_i = complex_proj_measurement([rho_r, rho_i], kernel_param, method='ensemble')
    ens_r = jax.block_until_ready(ens_r)
    ens_i = jax.block_until_ready(ens_i)
    diag_ref = jnp.maximum(jnp.einsum('btii->bti', rho_r), 1e-5)
    np.testing.assert_allclose(np.asarray(ens_r), np.asarray(diag_ref), rtol=1e-5, atol=1e-5)
    np.testing.assert_allclose(np.asarray(ens_i), np.zeros_like(np.asarray(ens_i)), atol=1e-6)

    # (e) sample path: shapes + sampled rows are valid kernel rows (one-hot for ortho init)
    samp_r, samp_i = complex_proj_measurement([rho_r, rho_i], kernel_param,
                                              method='sample', rng_key=k3)
    samp_r = jax.block_until_ready(samp_r)
    samp_i = jax.block_until_ready(samp_i)
    assert samp_r.shape == (B, T, D) and samp_i.shape == (B, T, D)
    np.testing.assert_allclose(np.asarray(samp_r).sum(-1), np.ones((B, T)), atol=1e-6)
    np.testing.assert_allclose(np.asarray(samp_i), np.zeros((B, T, D)), atol=1e-6)

    print("KERNEL_OK")
</pallas_src>

<mosaic_0001>
module attributes {stable_mosaic.version = 11 : i64} {
  func.func @_ensemble_kernel(%arg0: i32, %arg1: i32, %arg2: memref<8x256xf32, #tpu.memory_space<vmem>>, %arg3: memref<8x256xf32, #tpu.memory_space<vmem>>, %arg4: memref<256x128xf32, #tpu.memory_space<vmem>>, %arg5: memref<256x128xf32, #tpu.memory_space<vmem>>, %arg6: memref<128x128xf32, #tpu.memory_space<vmem>>, %arg7: memref<8x128xf32, #tpu.memory_space<vmem>>, %arg8: memref<8x128xf32, #tpu.memory_space<vmem>>) attributes {dimension_semantics = [#tpu.dimension_semantics<parallel>, #tpu.dimension_semantics<arbitrary>], iteration_bounds = array<i64: 2, 1>, scalar_prefetch = 0 : i64, scratch_operands = 1 : i64, tpu.core_type = #tpu.core_type<tc>, window_params = [{transform_indices = @transform_0, window_bounds = array<i64: 8, 256>}, {transform_indices = @transform_1, window_bounds = array<i64: 8, 256>}, {pipeline_mode = #tpu.pipeline_mode<synchronous>, transform_indices = @transform_2, window_bounds = array<i64: 256, 128>}, {pipeline_mode = #tpu.pipeline_mode<synchronous>, transform_indices = @transform_3, window_bounds = array<i64: 256, 128>}, {pipeline_mode = #tpu.pipeline_mode<synchronous>, transform_indices = @transform_4, window_bounds = array<i64: 128, 128>}, {transform_indices = @transform_5, window_bounds = array<i64: 8, 128>}]} {
    %c0_i32 = arith.constant 0 : i32
    %0 = arith.cmpi eq, %arg1, %c0_i32 : i32
    %1 = arith.extui %0 : i1 to i32
    %c0_i32_0 = arith.constant 0 : i32
    %2 = arith.cmpi ne, %1, %c0_i32_0 : i32
    scf.if %2 {
      %cst_15 = arith.constant 0.000000e+00 : f32
      %16 = vector.broadcast %cst_15 : f32 to vector<8x128xf32>
      %c0_16 = arith.constant 0 : index
      %c0_17 = arith.constant 0 : index
      %17 = vector.load %arg8[%c0_16, %c0_17] : memref<8x128xf32, #tpu.memory_space<vmem>>, vector<8x128xf32>
      tpu.vector_store %arg8[%c0_16, %c0_17], %16 {strides = array<i32>} : memref<8x128xf32, #tpu.memory_space<vmem>>, vector<8x128xf32>,
    } else {
    }
    %c0 = arith.constant 0 : index
    %c0_1 = arith.constant 0 : index
    %3 = vector.load %arg8[%c0, %c0_1] : memref<8x128xf32, #tpu.memory_space<vmem>>, vector<8x128xf32>
    %c0_2 = arith.constant 0 : index
    %c0_3 = arith.constant 0 : index
    %4 = vector.load %arg2[%c0_2, %c0_3] : memref<8x256xf32, #tpu.memory_space<vmem>>, vector<8x256xf32>
    %c0_4 = arith.constant 0 : index
    %c0_5 = arith.constant 0 : index
    %5 = vector.load %arg4[%c0_4, %c0_5] : memref<256x128xf32, #tpu.memory_space<vmem>>, vector<256x128xf32>
    %cst = arith.constant dense<0.000000e+00> : vector<8x128xf32>
    %6 = tpu.matmul %4, %5, %cst {dimension_numbers = #tpu.dot_dimension_numbers<[1], [0], [0], [1], [0, 0, 1, 1], [], []>} : vector<8x256xf32>, vector<256x128xf32>, vector<8x128xf32> -> vector<8x128xf32>
    %c0_6 = arith.constant 0 : index
    %c0_7 = arith.constant 0 : index
    %7 = vector.load %arg3[%c0_6, %c0_7] : memref<8x256xf32, #tpu.memory_space<vmem>>, vector<8x256xf32>
    %c0_8 = arith.constant 0 : index
    %c0_9 = arith.constant 0 : index
    %8 = vector.load %arg5[%c0_8, %c0_9] : memref<256x128xf32, #tpu.memory_space<vmem>>, vector<256x128xf32>
    %cst_10 = arith.constant dense<0.000000e+00> : vector<8x128xf32>
    %9 = tpu.matmul %7, %8, %cst_10 {dimension_numbers = #tpu.dot_dimension_numbers<[1], [0], [0], [1], [0, 0, 1, 1], [], []>} : vector<8x256xf32>, vector<256x128xf32>, vector<8x128xf32> -> vector<8x128xf32>
    %10 = arith.addf %6, %9 : vector<8x128xf32>
    %11 = arith.addf %3, %10 : vector<8x128xf32>
    %c0_11 = arith.constant 0 : index
    %c0_12 = arith.constant 0 : index
    %12 = vector.load %arg8[%c0_11, %c0_12] : memref<8x128xf32, #tpu.memory_space<vmem>>, vector<8x128xf32>
    tpu.vector_store %arg8[%c0_11, %c0_12], %11 {strides = array<i32>} : memref<8x128xf32, #tpu.memory_space<vmem>>, vector<8x128xf32>,
    %c0_i32_13 = arith.constant 0 : i32
    %13 = arith.cmpi eq, %arg1, %c0_i32_13 : i32
    %14 = arith.extui %13 : i1 to i32
    %c0_i32_14 = arith.constant 0 : i32
    %15 = arith.cmpi ne, %14, %c0_i32_14 : i32
    scf.if %15 {
      %c0_15 = arith.constant 0 : index
      %c0_16 = arith.constant 0 : index
      %16 = vector.load %arg8[%c0_15, %c0_16] : memref<8x128xf32, #tpu.memory_space<vmem>>, vector<8x128xf32>
      %cst_17 = arith.constant 9.99999974E-6 : f32
      %17 = vector.broadcast %cst_17 : f32 to vector<8x128xf32>
      %18 = arith.maximumf %16, %17 : vector<8x128xf32>
      %c0_18 = arith.constant 0 : index
      %c0_19 = arith.constant 0 : index
      %19 = vector.load %arg6[%c0_18, %c0_19] : memref<128x128xf32, #tpu.memory_space<vmem>>, vector<128x128xf32>
      %cst_20 = arith.constant dense<0.000000e+00> : vector<8x128xf32>
      %20 = tpu.matmul %18, %19, %cst_20 {dimension_numbers = #tpu.dot_dimension_numbers<[1], [0], [0], [1], [0, 0, 1, 1], [], []>} : vector<8x128xf32>, vector<128x128xf32>, vector<8x128xf32> -> vector<8x128xf32>
      %c0_21 = arith.constant 0 : index
      %c0_22 = arith.constant 0 : index
      %21 = vector.load %arg7[%c0_21, %c0_22] : memref<8x128xf32, #tpu.memory_space<vmem>>, vector<8x128xf32>
      tpu.vector_store %arg7[%c0_21, %c0_22], %20 {strides = array<i32>} : memref<8x128xf32, #tpu.memory_space<vmem>>, vector<8x128xf32>,
    } else {
    }
    return
  }
  func.func @transform_0(%arg0: i32, %arg1: i32) -> (i32, i32) {
    %c0_i32 = arith.constant 0 : i32
    return %arg0, %arg1 : i32, i32
  }
  func.func @transform_1(%arg0: i32, %arg1: i32) -> (i32, i32) {
    %c0_i32 = arith.constant 0 : i32
    return %arg0, %arg1 : i32, i32
  }
  func.func @transform_2(%arg0: i32, %arg1: i32) -> (i32, i32) {
    %c0_i32 = arith.constant 0 : i32
    %c0_i32_0 = arith.constant 0 : i32
    return %arg1, %c0_i32 : i32, i32
  }
  func.func @transform_3(%arg0: i32, %arg1: i32) -> (i32, i32) {
    %c0_i32 = arith.constant 0 : i32
    %c0_i32_0 = arith.constant 0 : i32
    return %arg1, %c0_i32 : i32, i32
  }
  func.func @transform_4(%arg0: i32, %arg1: i32) -> (i32, i32) {
    %c0_i32 = arith.constant 0 : i32
    %c0_i32_0 = arith.constant 0 : i32
    %c0_i32_1 = arith.constant 0 : i32
    return %c0_i32, %c0_i32_0 : i32, i32
  }
  func.func @transform_5(%arg0: i32, %arg1: i32) -> (i32, i32) {
    %c0_i32 = arith.constant 0 : i32
    %c0_i32_0 = arith.constant 0 : i32
    return %arg0, %c0_i32 : i32, i32
  }
}

</mosaic_0001>

<bundles_post_ra>
// kernel: tpu_custom_call.1
= control target key start
LH: loop header
LB: loop body
LE: loop exit
PB: predicated region body
PF: predicated region fallthrough
CT: control target
= control target key end

     0   :  { %s1768_s0 = inlined_call_operand.hbm [shape: f32[16,256], index: 0, kind: input, shape index: {}]   ;;  %s1769_s1 = inlined_call_operand.hbm [shape: f32[16,256], index: 1, kind: input, shape index: {}]   ;;  %s1770_s2 = inlined_call_operand.hbm [shape: f32[256,128], index: 2, kind: input, shape index: {}]   ;;  %s1771_s3 = inlined_call_operand.hbm [shape: f32[256,128], index: 3, kind: input, shape index: {}]   ;;  %s1772_s4 = inlined_call_operand.hbm [shape: f32[128,128], index: 4, kind: input, shape index: {}]   ;;  %s1773_s5 = inlined_call_operand.hbm [shape: f32[16,128], index: 5, kind: output, shape index: {}]  }
   0x1   :  { %1779 = sst [smem:[#allocation19_spill]] %s1770_s2 }
   0x2   :  { %1780 = sst [smem:[#allocation20_spill]] %s1771_s3 }
   0x3   :  { %1781 = sst [smem:[#allocation21_spill]] %s1772_s4 }
   0x4   :  { %10 = vsyncpa [#allocation4], 0 }
   0x5   :  { %12 = vsyncpa [#allocation4 + $0x1], 0 }
   0x6   :  { %13 = vsyncpa [#allocation7], 0 }
   0x7   :  { %15 = vsyncpa [#allocation7 + $0x1], 0 }
   0x8   :  { %16 = vsyncpa [#allocation10], 0 }
   0x9   :  { %17 = vsyncpa [#allocation5], 0 }
   0xa   :  { %19 = vsyncpa [#allocation5 + $0x1], 0  ;;  %s1443_s18 = smov 0   ;;  %s1445_s19 = smov 0  }
   0xb   :  { %s1447_s20 = smov 0   ;;  %s1449_s21 = smov 0  }
   0xc   :  { %s1451_s22 = smov 0   ;;  %s1453_s23 = smov 0  }
   0xd LB: > { %s1474_s24 = sadd.s32 4294967295, %s1400_s23   ;;  %s824_s25 = sadd.s32 4294967294, %s1400_s23   ;;  %s1400_s23 = sphi %s1453_s23, %s25_s23   ;;  %s1396_s22 = sphi %s1451_s22, %s1808_s22   ;;  %s1392_s21 = sphi %s1449_s21, %s1807_s21   ;;  %s1388_s20 = sphi %s1447_s20, %s1806_s20   ;;  %s1384_s19 = sphi %s1445_s19, %s1805_s19   ;;  %s1380_s18 = sphi %s1443_s18, %s1804_s18  }
   0xe   : > { %p59_p0 = scmp.ne.s32.totalorder %s1384_s19, %s1380_s18  ;;  %p1774_p1 = scmp.eq.s32.totalorder %s1474_s24, 0 }
   0xf   : > { %p190_p3 = scmp.eq.s32.totalorder %s824_s25, 1  ;;  %p825_p5 = scmp.ge.s32.totalorder %s1400_s23, 1 }
  0x10   : > { %p1483_p4 = por %p1774_p1, %p59_p0  ;;  %p197_p7 = scmp.lt.s32.totalorder %s1400_s23, 3 }
  0x11   : > { %p1488_p6 = por %p190_p3, %p59_p0  ;;  %s1402_s29 = smov [#allocation8]  }
  0x12   : > { %s1782_s26 = scalar_select %p1483_p4, 1, 0 }
  0x13   : > { %s1783_s27 = scalar_select %p1488_p6, 1, 0 }
  0x14   : > { %p1493_p8 = pnand %p825_p5, %p197_p7  ;;  %s212_s30 = sshll.u32 %s1402_s29, 4  ;;  %s1497_s30 = int_to_ptr.vmem [resolvable:$true] %s212_s30 }
  0x15   : > { %1784 = sst [smem:[#allocation18_spill]] %s1783_s27  ;;  %s1403_s7 = smov [#allocation9]  }
  0x16   : > { %s1785_s28 = scalar_select %p1493_p8, 1, 0 }
  0x17   : > { %p1077_p9 = pneg %p1493_p8  ;;  %s228_s8 = sshll.u32 %s1403_s7, 4  ;;  %s1508_s8 = int_to_ptr.vmem [resolvable:$true] %s228_s8 }
  0x18   : > { %s1404_s9 = smov [#allocation11]   ;;  %s1787_s2 = sld [smem:[#allocation19_spill]] }
  0x19   : > { %p1504_p11 = pnand %p1077_p9, %p1774_p1  ;;  %s1510_s10 = sshll.u32 %s1404_s9, 4  ;;  %s242_s10 = int_to_ptr.vmem [resolvable:$true] %s1510_s10 }
  0x1b   : > { %p1520_p13 = pneg %p1504_p11 }
  0x1e   : > { %s1162_s13 = scalar_lea.hbm %s1787_s2, 4096 }
  0x1f   : > { %p1163_p12 = scmp.ne.s32.totalorder %s1787_s2, %s1162_s13  ;;  %p1169_p5 = scmp.lt.u32.totalorder %s1162_s13, %s1787_s2 }
  0x21   : > { %p1165_p0 = pnand %p1520_p13, %p1163_p12 }
  0x23   : > { %p1166_p3 = pneg %p1165_p0 }
  0x25   : > { %p1171_p7 = pnand %p1169_p5, %p1166_p3 }
  0x27   : > { %1174 = shalt.err (!%p1171_p7)
}
  0x28   : > { %s1175_s29 = scalar_lea.vmem %s1497_s30, 4096  ;;  %p1183_p2 = scmp.lt.s32.totalorder %s1497_s30, %s1497_s30 }
  0x29   : > { %p1176_p9 = scmp.ne.s32.totalorder %s1497_s30, %s1175_s29  ;;  %p1184_p6 = scmp.lt.s32.totalorder %s1175_s29, %s1175_s29 }
  0x2b   : > { %p1178_p10 = pnand %p1176_p9, %p1520_p13  ;;  %p1185_p12 = por %p1184_p6, %p1183_p2 }
  0x2d   : > { %p1179_p1 = pneg %p1178_p10 }
  0x2f   : > { %p1186_p0 = pnand %p1185_p12, %p1179_p1 }
  0x31   : > { %1189 = shalt.err (!%p1186_p0)
}
  0x32   : > { %s1405_s7 = smov 128   ;;  %s1406_s9 = smov 8  }
  0x33   : > { %1080 = dma.hbm_to_vmem [thread:$0]  (!%p1504_p11), %s1787_s2, 4096, %s1497_s30, [#allocation7], %s1405_s7, %s1405_s7, %s1406_s9  }
  0x34   : > { %s1789_s3 = sld [smem:[#allocation20_spill]] }
  0x3a   : > { %s1190_s15 = scalar_lea.hbm %s1789_s3, 4096 }
  0x3b   : > { %p1191_p1 = scmp.ne.s32.totalorder %s1789_s3, %s1190_s15  ;;  %p1197_p10 = scmp.lt.u32.totalorder %s1190_s15, %s1789_s3 }
  0x3d   : > { %p1193_p2 = pnand %p1191_p1, %p1520_p13 }
  0x3f   : > { %p1194_p6 = pneg %p1193_p2 }
  0x41   : > { %p1199_p3 = pnand %p1197_p10, %p1194_p6 }
  0x43   : > { %1202 = shalt.err (!%p1199_p3)
}
  0x44   : > { %s1203_s30 = scalar_lea.vmem %s1508_s8, 4096  ;;  %p1211_p12 = scmp.lt.s32.totalorder %s1508_s8, %s1508_s8 }
  0x45   : > { %p1204_p5 = scmp.ne.s32.totalorder %s1508_s8, %s1203_s30  ;;  %p1212_p0 = scmp.lt.s32.totalorder %s1203_s30, %s1203_s30 }
  0x47   : > { %p1206_p7 = pnand %p1204_p5, %p1520_p13  ;;  %p1213_p1 = por %p1212_p0, %p1211_p12 }
  0x49   : > { %p1207_p9 = pneg %p1206_p7 }
  0x4b   : > { %p1214_p2 = pnand %p1213_p1, %p1207_p9 }
  0x4d   : > { %1217 = shalt.err (!%p1214_p2)
}
  0x4e   : > { %1083 = dma.hbm_to_vmem [thread:$0]  (!%p1504_p11), %s1789_s3, 4096, %s1508_s8, [#allocation10], %s1405_s7, %s1405_s7, %s1406_s9  }
  0x4f   : > { %s1790_s4 = sld [smem:[#allocation21_spill]] }
  0x55   : > { %s1218_s14 = scalar_lea.hbm %s1790_s4, 2048 }
  0x56   : > { %p1219_p6 = scmp.ne.s32.totalorder %s1790_s4, %s1218_s14  ;;  %p1225_p5 = scmp.lt.u32.totalorder %s1218_s14, %s1790_s4 }
  0x58   : > { %p1221_p10 = pnand %p1219_p6, %p1520_p13 }
  0x5a   : > { %p1222_p3 = pneg %p1221_p10 }
  0x5c   : > { %p1227_p7 = pnand %p1225_p5, %p1222_p3 }
  0x5e   : > { %1230 = shalt.err (!%p1227_p7)
}
  0x5f   : > { %s1231_s30 = scalar_lea.vmem %s242_s10, 2048  ;;  %p1239_p1 = scmp.lt.s32.totalorder %s242_s10, %s242_s10 }
  0x60   : > { %p1232_p9 = scmp.ne.s32.totalorder %s242_s10, %s1231_s30  ;;  %p1240_p2 = scmp.lt.s32.totalorder %s1231_s30, %s1231_s30 }
  0x62   : > { %p1234_p12 = pnand %p1232_p9, %p1520_p13  ;;  %p1241_p4 = por %p1240_p2, %p1239_p1 }
  0x64   : > { %p1235_p0 = pneg %p1234_p12 }
  0x66   : > { %p1242_p8 = pnand %p1241_p4, %p1235_p0 }
  0x68   : > { %1245 = shalt.err (!%p1242_p8)
}
  0x69   : > { %1086 = dma.hbm_to_vmem [thread:$0]  (!%p1504_p11), %s1790_s4, 2048, %s242_s10, [#allocation10], %s1405_s7, %s1405_s7, %s1406_s9  }
  0x6a   : > { %s46_s16 = sadd.s32 1, %s1388_s20  ;;  %s37_s6 = sadd.s32 1, %s1396_s22 }
  0x6b   : > { %p53_p4 = scmp.ne.s32.totalorder %s1388_s20, %s1384_s19  ;;  %p39_p8 = scmp.ge.s32.totalorder %s37_s6, 2 }
  0x6c   : > { %p54_p13 = scmp.eq.s32.totalorder %s1400_s23, 0  ;;  %p1791_p6 = scmp.eq.s32.totalorder %s1474_s24, 1 }
  0x6d   : > { %p1101_p3 = scmp.lt.s32.totalorder %s1400_s23, 2  ;;  %s1810_s6 = smov (%p39_p8, %s37_s6), 0 }
  0x6e   : > { %p1599_p10 = por %p1791_p6, %p53_p4  ;;  %p55_p5 = por %p54_p13, %p53_p4 }
  0x6f   : > { %s255_s12 = sand.u32 1, %s1388_s20   ;;  %s41_s13 = ssub.s32 %s1396_s22, %s1810_s6 }
  0x70   : > { %s1792_s11 = scalar_select %p1599_p10, 1, 0 }
  0x71   : > { %p44_p11 = scmp.eq.s32.totalorder %s41_s13, 0  ;;  %s1609_s10 = sshll.u32 %s255_s12, 4 }
  0x72   : > { %s847_s7 = sshll.u32 %s1396_s22, 8  ;;  %s259_s25 = scalar_lea.vmem [#allocation3], %s1609_s10 }
  0x73   : > { %s1613_s9 = scalar_select %p44_p11, %s1388_s20, %s46_s16  }
  0x74   : > { %s1618_s17 = scalar_lea.hbm %s1768_s0, %s847_s7  ;;  %s269_s29 = sshll.u32 %s259_s25, 4  ;;  %s1621_s29 = int_to_ptr.vmem [resolvable:$true] %s269_s29 }
  0x75   : > { %p1625_p7 = pnand %p1101_p3, %p55_p5  ;;  %s1632_s16 = scalar_lea.hbm %s1769_s1, %s847_s7 }
  0x76   : > { %s276_s13 = sand.u32 1, %s1400_s23   ;;  %s256_s14 = scalar_lea.sflag [#allocation4], %s255_s12 }
  0x77   : > { %s1246_s15 = scalar_lea.hbm %s1618_s17, 256  ;;  %p1248_p12 = pneg %p1625_p7 }
  0x78   : > { %p1247_p9 = scmp.ne.s32.totalorder %s1618_s17, %s1246_s15  ;;  %s1251_s3 = scalar_lea.hbm %s1768_s0, 512 }
  0x79   : > { %p1252_p2 = scmp.lt.u32.totalorder %s1618_s17, %s1768_s0  ;;  %p1253_p4 = scmp.lt.u32.totalorder %s1251_s3, %s1246_s15 }
  0x7a   : > { %p1249_p0 = pnand %p1248_p12, %p1247_p9  ;;  %p1255_p13 = scmp.lt.u32.totalorder %s1246_s15, %s1618_s17 }
  0x7b   : > { %p1254_p8 = por %p1253_p4, %p1252_p2 }
  0x7c   : > { %p1250_p1 = pneg %p1249_p0 }
  0x7d   : > { %p1256_p6 = por %p1255_p13, %p1254_p8 }
  0x7f   : > { %p1257_p3 = pnand %p1256_p6, %p1250_p1 }
  0x81   : > { %1260 = shalt.err (!%p1257_p3)
}
  0x82   : > { %s1261_s12 = scalar_lea.vmem %s1621_s29, 256  ;;  %s1407_s2 = smov [#allocation3]  }
  0x83   : > { %p1262_p5 = scmp.ne.s32.totalorder %s1621_s29, %s1261_s12  ;;  %s1266_s7 = sshll.u32 %s1407_s2, 4  ;;  %s1267_s7 = int_to_ptr.vmem [resolvable:$false] %s1266_s7 }
  0x84   : > { %s1268_s4 = scalar_lea.vmem %s1267_s7, 512  ;;  %p1269_p0 = scmp.lt.s32.totalorder %s1621_s29, %s1267_s7 }
  0x85   : > { %p1264_p11 = pnand %p1262_p5, %p1248_p12  ;;  %p1270_p2 = scmp.lt.s32.totalorder %s1268_s4, %s1261_s12 }
  0x87   : > { %p1265_p9 = pneg %p1264_p11  ;;  %p1271_p4 = por %p1270_p2, %p1269_p0 }
  0x89   : > { %p1272_p8 = pnand %p1271_p4, %p1265_p9 }
  0x8b   : > { %1275 = shalt.err (!%p1272_p8)
}
  0x8c   : > { %1090 = dma.hbm_to_vmem [thread:$0]  (!%p1625_p7), %s1618_s17, 256, %s1621_s29, %s256_s14  }
  0x8d   : > { %s280_s3 = scalar_lea.vmem [#allocation6], %s1609_s10  ;;  %s277_s15 = scalar_lea.sflag [#allocation7], %s276_s13 }
  0x8e   : > { %s290_s27 = sshll.u32 %s280_s3, 4  ;;  %s1276_s25 = scalar_lea.hbm %s1632_s16, 256  ;;  %s291_s27 = int_to_ptr.vmem [resolvable:$true] %s290_s27 }
  0x8f   : > { %p1277_p1 = scmp.ne.s32.totalorder %s1632_s16, %s1276_s25  ;;  %s1281_s2 = scalar_lea.hbm %s1769_s1, 512 }
  0x90   : > { %p1282_p3 = scmp.lt.u32.totalorder %s1632_s16, %s1769_s1  ;;  %p1283_p5 = scmp.lt.u32.totalorder %s1281_s2, %s1276_s25 }
  0x91   : > { %p1279_p13 = pnand %p1277_p1, %p1248_p12  ;;  %p1285_p9 = scmp.lt.u32.totalorder %s1276_s25, %s1632_s16 }
  0x92   : > { %p1284_p11 = por %p1283_p5, %p1282_p3 }
  0x93   : > { %p1280_p6 = pneg %p1279_p13 }
  0x94   : > { %p1286_p0 = por %p1285_p9, %p1284_p11 }
  0x96   : > { %p1287_p2 = pnand %p1286_p0, %p1280_p6 }
  0x98   : > { %1290 = shalt.err (!%p1287_p2)
}
  0x99   : > { %s1291_s10 = scalar_lea.vmem %s291_s27, 256  ;;  %s1408_s17 = smov [#allocation6]  }
  0x9a   : > { %p1292_p4 = scmp.ne.s32.totalorder %s291_s27, %s1291_s10  ;;  %s1296_s29 = sshll.u32 %s1408_s17, 4  ;;  %s1297_s29 = int_to_ptr.vmem [resolvable:$false] %s1296_s29 }
  0x9b   : > { %s1298_s13 = scalar_lea.vmem %s1297_s29, 512  ;;  %p1299_p13 = scmp.lt.s32.totalorder %s291_s27, %s1297_s29 }
  0x9c   : > { %p1294_p8 = pnand %p1292_p4, %p1248_p12  ;;  %p1300_p10 = scmp.lt.s32.totalorder %s1298_s13, %s1291_s10 }
  0x9e   : > { %p1295_p1 = pneg %p1294_p8  ;;  %p1301_p3 = por %p1300_p10, %p1299_p13 }
  0xa0   : > { %p1302_p5 = pnand %p1301_p3, %p1295_p1 }
  0xa2   : > { %1305 = shalt.err (!%p1302_p5)
}
  0xa3   : > { %1093 = dma.hbm_to_vmem [thread:$0]  (!%p1625_p7), %s1632_s16, 256, %s291_s27, %s277_s15  }
  0xa4   : > { %p1794_p6 = scmp.ne.s32.totalorder %s1785_s28, 0 }
  0xa5   : > { %s1685_s14 = sand.u32 (!%p1794_p6), 1, %s1384_s19   ;;  %p1795_p10 = scmp.ne.s32.totalorder (!%p1794_p6), %s1782_s26, 0 }
  0xa6   : > { %299 = sbr.rel (%p1794_p6) target bundleno = 665 (0x299), region = 40  ;;  %s837_s3 = sshll.u32 (!%p1794_p6), %s1685_s14, 4 }
  0xa7   : > { %s302_s25 = scalar_lea.sflag (!%p1794_p6), [#allocation4], %s1685_s14  ;;  %s1689_s8 = scalar_lea.vmem (!%p1794_p6), [#allocation3], %s837_s3 }
  0xad   : > { %1359 = dma.done.wait (%p1795_p10), %s302_s25, 256  }
  0xae   : > { %1361 = vsyncadd (%p1795_p10), %s302_s25, 4294967040  ;;  %s310_s30 = sand.u32 1, %s1474_s24   ;;  %s1696_s16 = scalar_lea.vmem [#allocation6], %s837_s3 }
  0xaf   : > { %s311_s28 = scalar_lea.sflag [#allocation7], %s310_s30 }
  0xb0   : > { %1363 = dma.done.wait (%p1795_p10), %s311_s28, 256  }
  0xb1   : > { %1365 = vsyncadd (%p1795_p10), %s311_s28, 4294967040  ;;  %p1796_p7 = scmp.eq.s32.totalorder %s1474_s24, 0 }
  0xb3   : > { %1367 = dma.done.wait (%p1796_p7), [#allocation7], 4096   ;;  %p1797_p12 = pmov %p1796_p7 }
  0xb4   : > { %p1798_p11 = pmov %p1796_p7 }
  0xb5   : > { %1369 = vsyncadd (%p1797_p12), [#allocation7], 4294963200 }
  0xb6   : > { %1371 = dma.done.wait (%p1798_p11), [#allocation10], 6144   ;;  %p1799_p9 = pmov %p1796_p7 }
  0xb7   : > { %v420_v0 = vld [vmem:[#allocation9 + $0x80] sm:$0xff]  ;;  %v421_v1 = vld [vmem:[#allocation9 + $0x88] sm:$0xff]  ;;  %v422_v11 = vld [vmem:[#allocation9 + $0x90] sm:$0xff]  ;;  %vm1410_vm0 = vmmov 0   ;;  %s842_s24 = sshll.u32 %s1685_s14, 3  ;;  %s844_s15 = sshll.u32 %s1392_s21, 7 }
  0xb8   : > { %1373 = vsyncadd (%p1799_p9), [#allocation10], 4294961152  ;;  %v386_v2 = vld [vmem:[#allocation8 + $0x80] sm:$0xff]  ;;  %v971_v3 = vpack.c.bf16 %v421_v1, %v420_v0  ;;  %v387_v4 = vld [vmem:[#allocation8 + $0x88] sm:$0xff]  ;;  %s357_s26 = scalar_lea.vmem [#allocation12], %s842_s24  ;;  %s1721_s7 = scalar_lea.hbm %s1773_s5, %s844_s15 }
  0xb9   : > { %v404_v5 = vld [vmem:[#allocation9] sm:$0xff]  ;;  %v405_v6 = vld [vmem:[#allocation9 + $0x8] sm:$0xff]  ;;  %v1003_v7 = vpack.c.bf16 %v387_v4, %v386_v2  ;;  %v423_v13 = vld [vmem:[#allocation9 + $0x98] sm:$0xff]  ;;  %s684_s27 = sshll.u32 %s357_s26, 4  ;;  %s671_s4 = scalar_lea.sflag [#allocation5], %s1685_s14  ;;  %s1716_s27 = int_to_ptr.vmem [resolvable:$true] %s684_s27 }
  0xba   : > { %v973_v8 = vpack.c.bf16 %v405_v6, %v404_v5  ;;  %v370_v9 = vld [vmem:[#allocation8] sm:$0xff]  ;;  %v371_v10 = vld [vmem:[#allocation8 + $0x8] sm:$0xff]  ;;  %972 = vmatprep.subr.bf16.mxu0 %v971_v3  ;;  %v388_v14 = vld [vmem:[#allocation8 + $0x90] sm:$0xff]  ;;  %v975_v16 = vpack.c.bf16 %v423_v13, %v422_v11  ;;  %s1306_s10 = scalar_lea.vmem %s1716_s27, 128  ;;  %p1800_p2 = scmp.ne.s32.totalorder %s1792_s11, 0 }
  0xbb   : > { %v1005_v12 = vpack.c.bf16 %v371_v10, %v370_v9  ;;  %v389_v15 = vld [vmem:[#allocation8 + $0x98] sm:$0xff]  ;;  %1004 = vmatprep.subr.bf16.mxu1 %v1003_v7  ;;  %v406_v18 = vld [vmem:[#allocation9 + $0x10] sm:$0xff]  ;;  %v424_v23 = vld [vmem:[#allocation9 + $0xa0] sm:$0xff]  ;;  %p1307_p0 = scmp.ne.s32.totalorder %s1716_s27, %s1306_s10  ;;  %s1412_s21 = smov [#allocation12]  }
  0xbc   : > { %974 = vmatpush3.bf16.msra.mxu0 %v973_v8  ;;  %v1007_v17 = vpack.c.bf16 %v389_v15, %v388_v14  ;;  %v407_v19 = vld [vmem:[#allocation9 + $0x18] sm:$0xff]  ;;  %v372_v20 = vld [vmem:[#allocation8 + $0x10] sm:$0xff]  ;;  %v425_v24 = vld [vmem:[#allocation9 + $0xa8] sm:$0xff]  ;;  %s1310_s17 = sshll.u32 %s1412_s21, 4  ;;  %s1311_s17 = int_to_ptr.vmem [resolvable:$false] %s1310_s17 }
  0xbd   : > { %1006 = vmatpush3.bf16.msra.mxu1 %v1005_v12  ;;  %v977_v21 = vpack.c.bf16 %v407_v19, %v406_v18  ;;  %v373_v22 = vld [vmem:[#allocation8 + $0x18] sm:$0xff]  ;;  %976 = vmatprep.subr.bf16.mxu0 %v975_v16  ;;  %v979_v26 = vpack.c.bf16 %v425_v24, %v424_v23  ;;  %v390_v27 = vld [vmem:[#allocation8 + $0xa0] sm:$0xff]  ;;  %v391_v28 = vld [vmem:[#allocation8 + $0xa8] sm:$0xff]  ;;  %p1308_p4 = pnand %p1307_p0, %p1800_p2  ;;  %s1312_s29 = scalar_lea.vmem %s1311_s17, 256 }
  0xbe   : > { %1008 = vmatprep.subr.bf16.mxu1 %v1007_v17  ;;  %v1009_v25 = vpack.c.bf16 %v373_v22, %v372_v20  ;;  %v408_v29 = vld [vmem:[#allocation9 + $0x20] sm:$0xff]  ;;  %v1011_v30 = vpack.c.bf16 %v391_v28, %v390_v27  ;;  %v409_v31 = vld [vmem:[#allocation9 + $0x28] sm:$0xff]  ;;  %v426_v35 = vld [vmem:[#allocation9 + $0xb0] sm:$0xff]  ;;  %p1313_p1 = scmp.lt.s32.totalorder %s1716_s27, %s1311_s17  ;;  %p1314_p13 = scmp.lt.s32.totalorder %s1312_s29, %s1306_s10 }
  0xbf   : > { %v374_v32 = vld [vmem:[#allocation8 + $0x20] sm:$0xff]  ;;  %v375_v33 = vld [vmem:[#allocation8 + $0x28] sm:$0xff]  ;;  %v981_v34 = vpack.c.bf16 %v409_v31, %v408_v29  ;;  %v427_v36 = vld [vmem:[#allocation9 + $0xb8] sm:$0xff]  ;;  %p1309_p8 = pneg %p1308_p4 }
  0xc0   : > { %978 = vmatpush3.bf16.msra.mxu0 %v977_v21  ;;  %v392_v37 = vld [vmem:[#allocation8 + $0xb0] sm:$0xff]  ;;  %v1013_v38 = vpack.c.bf16 %v375_v33, %v374_v32  ;;  %v983_v39 = vpack.c.bf16 %v427_v36, %v426_v35  ;;  %v393_v40 = vld [vmem:[#allocation8 + $0xb8] sm:$0xff]  ;;  %v428_v46 = vld [vmem:[#allocation9 + $0xc0] sm:$0xff]  ;;  %p1315_p3 = por %p1314_p13, %p1313_p1 }
  0xc1   : > { %1010 = vmatpush3.bf16.msra.mxu1 %v1009_v25  ;;  %980 = vmatprep.subr.bf16.mxu0 %v979_v26  ;;  %v410_v41 = vld [vmem:[#allocation9 + $0x30] sm:$0xff]  ;;  %v411_v42 = vld [vmem:[#allocation9 + $0x38] sm:$0xff]  ;;  %v1015_v43 = vpack.c.bf16 %v393_v40, %v392_v37  ;;  %v429_v47 = vld [vmem:[#allocation9 + $0xc8] sm:$0xff] }
  0xc2   : > { %1012 = vmatprep.subr.bf16.mxu1 %v1011_v30  ;;  %v376_v44 = vld [vmem:[#allocation8 + $0x30] sm:$0xff]  ;;  %v377_v45 = vld [vmem:[#allocation8 + $0x38] sm:$0xff]  ;;  %v394_v48 = vld [vmem:[#allocation8 + $0xc0] sm:$0xff]  ;;  %v985_v50 = vpack.c.bf16 %v411_v42, %v410_v41  ;;  %v987_v52 = vpack.c.bf16 %v429_v47, %v428_v46  ;;  %p1316_p5 = pnand %p1315_p3, %p1309_p8 }
  0xc3   : > { %v395_v49 = vld [vmem:[#allocation8 + $0xc8] sm:$0xff]  ;;  %v1017_v51 = vpack.c.bf16 %v377_v45, %v376_v44  ;;  %v412_v53 = vld [vmem:[#allocation9 + $0x40] sm:$0xff]  ;;  %v430_v58 = vld [vmem:[#allocation9 + $0xd0] sm:$0xff] }
  0xc4   : > { %982 = vmatpush3.bf16.msra.mxu0 %v981_v34  ;;  %v413_v54 = vld [vmem:[#allocation9 + $0x48] sm:$0xff]  ;;  %v378_v55 = vld [vmem:[#allocation8 + $0x40] sm:$0xff]  ;;  %v1019_v56 = vpack.c.bf16 %v395_v49, %v394_v48  ;;  %v431_v59 = vld [vmem:[#allocation9 + $0xd8] sm:$0xff] }
  0xc5   : > { %1014 = vmatpush3.bf16.msra.mxu1 %v1013_v38  ;;  %984 = vmatprep.subr.bf16.mxu0 %v983_v39  ;;  %v379_v57 = vld [vmem:[#allocation8 + $0x48] sm:$0xff]  ;;  %v396_v60 = vld [vmem:[#allocation8 + $0xd0] sm:$0xff]  ;;  %v397_v61 = vld [vmem:[#allocation8 + $0xd8] sm:$0xff]  ;;  %v989_v62 = vpack.c.bf16 %v413_v54, %v412_v53  ;;  %v991_v0 = vpack.c.bf16 %v431_v59, %v430_v58  ;;  %v1409_v39 = vmov 0.0|0.0  }
  0xc6   : > { %1016 = vmatprep.subr.bf16.mxu1 %v1015_v43  ;;  %v1021_v63 = vpack.c.bf16 %v379_v57, %v378_v55  ;;  %v414_v1 = vld [vmem:[#allocation9 + $0x50] sm:$0xff]  ;;  %v415_v2 = vld [vmem:[#allocation9 + $0x58] sm:$0xff]  ;;  %v1023_v4 = vpack.c.bf16 %v397_v61, %v396_v60  ;;  %v432_v6 = vld [vmem:[#allocation9 + $0xe0] sm:$0xff]  ;;  %v1411_v61 = vmov 0.0  }
  0xc7   : > { %v380_v3 = vld [vmem:[#allocation8 + $0x50] sm:$0xff]  ;;  %v381_v5 = vld [vmem:[#allocation8 + $0x58] sm:$0xff]  ;;  %v433_v7 = vld [vmem:[#allocation9 + $0xe8] sm:$0xff]  ;;  %v993_v10 = vpack.c.bf16 %v415_v2, %v414_v1 }
  0xc8   : > { %986 = vmatpush3.bf16.msra.mxu0 %v985_v50  ;;  %v398_v8 = vld [vmem:[#allocation8 + $0xe0] sm:$0xff]  ;;  %v399_v9 = vld [vmem:[#allocation8 + $0xe8] sm:$0xff]  ;;  %v1025_v13 = vpack.c.bf16 %v381_v5, %v380_v3  ;;  %v995_v14 = vpack.c.bf16 %v433_v7, %v432_v6  ;;  %v434_v20 = vld [vmem:[#allocation9 + $0xf0] sm:$0xff] }
  0xc9   : > { %1018 = vmatpush3.bf16.msra.mxu1 %v1017_v51  ;;  %988 = vmatprep.subr.bf16.mxu0 %v987_v52  ;;  %v416_v11 = vld [vmem:[#allocation9 + $0x60] sm:$0xff]  ;;  %v417_v12 = vld [vmem:[#allocation9 + $0x68] sm:$0xff]  ;;  %v1027_v18 = vpack.c.bf16 %v399_v9, %v398_v8  ;;  %v435_v21 = vld [vmem:[#allocation9 + $0xf8] sm:$0xff] }
  0xca   : > { %1020 = vmatprep.subr.bf16.mxu1 %v1019_v56  ;;  %v382_v15 = vld [vmem:[#allocation8 + $0x60] sm:$0xff]  ;;  %v403_v16 = vld [vmem:[%s1696_s16 + $0x8] sm:$0xff]  ;;  %v400_v22 = vld [vmem:[#allocation8 + $0xf0] sm:$0xff]  ;;  %v997_v24 = vpack.c.bf16 %v417_v12, %v416_v11  ;;  %v999_v26 = vpack.c.bf16 %v435_v21, %v434_v20 }
  0xcb   : > { %v369_v17 = vld [vmem:[%s1689_s8 + $0x8] sm:$0xff]  ;;  %500 = vmatprep.mubr.f32.mxu0 %v403_v16  ;;  %v418_v27 = vld [vmem:[#allocation9 + $0x70] sm:$0xff]  ;;  %v583_v34 = vld [vmem:[#allocation11] sm:$0xff] }
  0xcc   : > { %990 = vmatpush3.bf16.msra.mxu0 %v989_v62  ;;  %v383_v19 = vld [vmem:[#allocation8 + $0x68] sm:$0xff]  ;;  %v401_v23 = vld [vmem:[#allocation8 + $0xf8] sm:$0xff]  ;;  %570 = vmatprep.mubr.f32.mxu1 %v369_v17  ;;  %v384_v30 = vld [vmem:[#allocation8 + $0x70] sm:$0xff] }
  0xcd   : > { %1022 = vmatpush3.bf16.msra.mxu1 %v1021_v63  ;;  %992 = vmatprep.subr.bf16.mxu0 %v991_v0  ;;  %v1029_v25 = vpack.c.bf16 %v383_v19, %v382_v15  ;;  %v419_v28 = vld [vmem:[#allocation9 + $0x78] sm:$0xff]  ;;  %v1031_v29 = vpack.c.bf16 %v401_v23, %v400_v22  ;;  %v584_v35 = vld [vmem:[#allocation11 + $0x8] sm:$0xff]  ;;  %v402_v36 = vld [vmem:[%s1696_s16] sm:$0xff] }
  0xce   : > { %1024 = vmatprep.subr.bf16.mxu1 %v1023_v4  ;;  %v385_v31 = vld [vmem:[#allocation8 + $0x78] sm:$0xff]  ;;  %v1001_v32 = vpack.c.bf16 %v419_v28, %v418_v27  ;;  %v1036_v37 = vpack.c.bf16 %v584_v35, %v583_v34  ;;  %v368_v38 = vld [vmem:[%s1689_s8] sm:$0xff]  ;;  %v588_v44 = vld [vmem:[#allocation11 + $0x28] sm:$0xff] }
  0xcf   : > { %v1033_v33 = vpack.c.bf16 %v385_v31, %v384_v30  ;;  %v585_v40 = vld [vmem:[#allocation11 + $0x10] sm:$0xff]  ;;  %v586_v41 = vld [vmem:[#allocation11 + $0x18] sm:$0xff]  ;;  %v587_v43 = vld [vmem:[#allocation11 + $0x20] sm:$0xff] }
  0xd0   : > { %994 = vmatpush3.bf16.msra.mxu0 %v993_v10  ;;  %v1039_v42 = vpack.c.bf16 %v586_v41, %v585_v40  ;;  %v1042_v45 = vpack.c.bf16 %v588_v44, %v587_v43  ;;  %v589_v46 = vld [vmem:[#allocation11 + $0x30] sm:$0xff]  ;;  %v590_v47 = vld [vmem:[#allocation11 + $0x38] sm:$0xff]  ;;  %v591_v49 = vld [vmem:[#allocation11 + $0x40] sm:$0xff] }
  0xd1   : > { %1026 = vmatpush3.bf16.msra.mxu1 %v1025_v13  ;;  %996 = vmatprep.subr.bf16.mxu0 %v995_v14  ;;  %v1045_v48 = vpack.c.bf16 %v590_v47, %v589_v46  ;;  %v592_v50 = vld [vmem:[#allocation11 + $0x48] sm:$0xff]  ;;  %v593_v52 = vld [vmem:[#allocation11 + $0x50] sm:$0xff]  ;;  %v594_v53 = vld [vmem:[#allocation11 + $0x58] sm:$0xff] }
  0xd2   : > { %1028 = vmatprep.subr.bf16.mxu1 %v1027_v18  ;;  %v1048_v51 = vpack.c.bf16 %v592_v50, %v591_v49  ;;  %v1051_v54 = vpack.c.bf16 %v594_v53, %v593_v52  ;;  %v595_v55 = vld [vmem:[#allocation11 + $0x60] sm:$0xff]  ;;  %v596_v56 = vld [vmem:[#allocation11 + $0x68] sm:$0xff]  ;;  %v597_v58 = vld [vmem:[#allocation11 + $0x70] sm:$0xff] }
  0xd3   : > { %v1054_v57 = vpack.c.bf16 %v596_v56, %v595_v55  ;;  %v598_v59 = vld [vmem:[#allocation11 + $0x78] sm:$0xff] }
  0xd4   : > { %998 = vmatpush3.bf16.msra.mxu0 %v997_v24  ;;  %v1057_v60 = vpack.c.bf16 %v598_v59, %v597_v58 }
  0xd5   : > { %1030 = vmatpush3.bf16.msra.mxu1 %v1029_v25  ;;  %1000 = vmatprep.subr.bf16.mxu0 %v999_v26 }
  0xd6   : > { %1032 = vmatprep.subr.bf16.mxu1 %v1031_v29 }
  0xd8   : > { %1002 = vmatpush3.bf16.msra.mxu0 %v1001_v32 }
  0xd9   : > { %1034 = vmatpush3.bf16.msra.mxu1 %v1033_v33  ;;  %1035 = vmatprep.subr.bf16.mxu0 %v1409_v39 }
  0xdb   : > { %501 = vmatmul.mubr.f32.vlgmr.msra.gmra.mrb[0].mxu0 %v402_v36 }
  0xdc   : > { %571 = vmatmul.mubr.f32.vlgmr.msra.gmra.mrb[0].mxu1 %v368_v38  ;;  %1037 = vmatpush3.bf16.msra.mxu0 %v1036_v37 }
  0xdd   : > { %1038 = vmatprep.subr.bf16.mxu0 %v1409_v39  ;;  %968 = vmatprep.mubr.msk.f32.mxu0 %vm1410_vm0, %v1411_v61 }
  0xe0   : > { %1040 = vmatpush3.bf16.msra.mxu0 %v1039_v42 }
  0xe1   : > { %1041 = vmatprep.subr.bf16.mxu0 %v1409_v39 }
  0xe4   : > { %1043 = vmatpush3.bf16.msra.mxu0 %v1042_v45 }
  0xe5   : > { %1044 = vmatprep.subr.bf16.mxu0 %v1409_v39 }
  0xe8   : > { %1046 = vmatpush3.bf16.msra.mxu0 %v1045_v48 }
  0xe9   : > { %1047 = vmatprep.subr.bf16.mxu0 %v1409_v39 }
  0xec   : > { %1049 = vmatpush3.bf16.msra.mxu0 %v1048_v51 }
  0xed   : > { %1050 = vmatprep.subr.bf16.mxu0 %v1409_v39 }
  0xf0   : > { %1052 = vmatpush3.bf16.msra.mxu0 %v1051_v54 }
  0xf1   : > { %1053 = vmatprep.subr.bf16.mxu0 %v1409_v39 }
  0xf4   : > { %1055 = vmatpush3.bf16.msra.mxu0 %v1054_v57 }
  0xf5   : > { %1056 = vmatprep.subr.bf16.mxu0 %v1409_v39 }
  0xf8   : > { %1058 = vmatpush3.bf16.msra.mxu0 %v1057_v60 }
 0x1ae   : > { %v881_v62 = vpop.f32.mrb[0].mxu0 }
 0x1af   : > { %v916_v63 = vpop.f32.mrb[0].mxu1  ;;  %v882_v0 = vpop.f32.mrb[1].mxu0 }
 0x1b0   : > { %v883_v1 = vadd.f32 %v882_v0, %v881_v62  ;;  %v917_v2 = vpop.f32.mrb[1].mxu1 }
 0x1b1   : > { %v918_v3 = vadd.f32 %v917_v2, %v916_v63 }
 0x1b3   : > { %v573_v4 = vadd.f32 %v918_v3, %v883_v1 }
 0x1b5   : > { %v582_v5 = vmax.f32 %v573_v4, 1e-05 }
 0x1b7   : > { %969 = vmatmul.mubr.f32.vlgmr.msra.gmra.mrb[2].mxu0 %v582_v5 }
 0x28a   : > { %v665_v6 = vpop.f32.mrb[2].mxu0 }
 0x28b   : > { %669 = vst [vmem:[%s357_s26] sm:$0xff] %v665_v6  ;;  %v970_v7 = vpop.f32.mrb[3].mxu0 }
 0x28c   : > { %1319 = shalt.err (!%p1316_p5)
}
 0x28d   : > { %s1320_s13 = scalar_lea.hbm %s1721_s7, 128  ;;  %s1324_s25 = scalar_lea.hbm %s1773_s5, 256 }
 0x28e   : > { %p1321_p6 = scmp.ne.s32.totalorder %s1721_s7, %s1320_s13  ;;  %p1325_p12 = scmp.lt.u32.totalorder %s1721_s7, %s1773_s5 }
 0x28f   : > { %p1326_p11 = scmp.lt.u32.totalorder %s1324_s25, %s1320_s13  ;;  %p1328_p0 = scmp.lt.u32.totalorder %s1320_s13, %s1721_s7 }
 0x290   : > { %p1322_p10 = pnand %p1321_p6, %p1800_p2 }
 0x291   : > { %p1327_p9 = por %p1326_p11, %p1325_p12 }
 0x292   : > { %p1323_p7 = pneg %p1322_p10 }
 0x293   : > { %p1329_p4 = por %p1328_p0, %p1327_p9 }
 0x295   : > { %p1330_p8 = pnand %p1329_p4, %p1323_p7 }
 0x297   : > { %1333 = shalt.err (!%p1330_p8)
}
 0x298   : > { %1075 = dma.vmem_to_hbm [thread:$0]  (%p1800_p2), %s1716_s27, 128, %s1721_s7, %s671_s4  }
 0x299 PF: > { %s1801_s28 = sld [smem:[#allocation18_spill]]  ;;  %s696_s16 = sand.u32 1, %s1380_s18  }
 0x29a   : > { %p1803_p13 = scmp.ge.s32.totalorder %s1400_s23, 2  ;;  %s697_s24 = scalar_lea.sflag [#allocation5], %s696_s16 }
 0x29f   : > { %p1802_p1 = scmp.ne.s32.totalorder %s1801_s28, 0 }
 0x2a1   : > { %p1095_p3 = pnand %p1803_p13, %p1802_p1 }
 0x2a3   : > { %1375 = dma.done.wait (!%p1095_p3), %s697_s24, 128  }
 0x2a4   : > { %1377 = vsyncadd (!%p1095_p3), %s697_s24, 4294967168  ;;  %s25_s23 = sadd.s32 1, %s1400_s23   ;;  %s1804_s18 = smov %s1384_s19 }
 0x2a5   : > { %p22_p5 = scmp.ge.s32.totalorder %s25_s23, 4   ;;  %s1805_s19 = smov %s1388_s20 }
 0x2a6   : > { %s1806_s20 = smov %s1613_s9  ;;  %s1807_s21 = smov %s1396_s22 }
 0x2a7   : > { %s1808_s22 = smov %s1810_s6  ;;  %24 = sbr.rel (!%p22_p5) target bundleno = 13 (0xd), region = 120 }
 0x2ae   :  { %702 = vsyncpa [#allocation4], 1 }
 0x2af   :  { %704 = vsyncpa [#allocation4 + $0x1], 1 }
 0x2b0   :  { %705 = vsyncpa [#allocation7], 1 }
 0x2b1   :  { %707 = vsyncpa [#allocation7 + $0x1], 1 }
 0x2b2   :  { %708 = vsyncpa [#allocation10], 1 }
 0x2b3   :  { %709 = vsyncpa [#allocation5], 1 }
 0x2b4   :  { %711 = vsyncpa [#allocation5 + $0x1], 1 }

</bundles_post_ra>
